<compile_context>
chip_gen: v7x
topology: tpu7x:2x2x1
jax: 0.10.0
libtpu: 0.0.40
codegen_flags: <defaults>
</compile_context>

<pallas_src>
import jax
import jax.numpy as jnp
from jax.experimental import pallas as pl
from jax.experimental.pallas import tpu as pltpu

A_PAD = 128  # lane-dense action width used ONLY for the in-kernel logits vregs


def _round_up(n, m):
    return ((n + m - 1) // m) * m


def policy_net_kernel(x_ref, w1_ref, b1_ref, w2_ref, b2_ref, out_ref):
    # --- fc1 + ReLU (bf16 MXU operands, f32 accumulation) -----------------
    h = jnp.dot(x_ref[...], w1_ref[...],
                preferred_element_type=jnp.float32)            # (tb, H) f32
    h = jnp.maximum(h + b1_ref[...], 0.0)                      # bias + ReLU in f32

    # --- fc2 (action dim padded to 128 lanes for aligned MXU work) --------
    logits = jnp.dot(h.astype(jnp.bfloat16), w2_ref[...],
                     preferred_element_type=jnp.float32)       # (tb, 128) f32
    logits = logits + b2_ref[...]                              # pad lanes -> -1e30

    # --- softmax over the last axis (== dim=1 for 2-D input), exact divide -
    m = jnp.max(logits, axis=-1, keepdims=True)
    e = jnp.exp(logits - m)                                    # pad lanes -> exactly 0
    denom = jnp.sum(e, axis=-1, keepdims=True)
    probs = e / denom                                          # rows sum to 1 (f32 exact)

    # Narrow store: only the real action columns go back to HBM.
    a = out_ref.shape[-1]
    out_ref[...] = probs[:, :a].astype(out_ref.dtype)


def policy_net_forward(x, w1_t, b1, w2_t, b2, *, block_b=2048):
    """x: (B, state_dim); w1_t: (state_dim, hidden); w2_t: (hidden, action_dim).

    Returns softmax probabilities of shape (B, action_dim), float32.
    """
    B, S = x.shape
    H, A = w2_t.shape
    assert w1_t.shape == (S, H)

    # bf16 operands for the MXU; biases stay f32 (added post-accumulation).
    xb = x.astype(jnp.bfloat16)
    w1b = w1_t.astype(jnp.bfloat16)
    b1f = b1.reshape(1, H).astype(jnp.float32)

    # Pad fc2's action dim to a full 128-lane vreg: zero weight columns and a
    # very negative *finite f32* bias so padded logits contribute exactly 0
    # after exp.  (Keep this bias in f32; -1e30 would overflow fp16.)
    w2b = jnp.zeros((H, A_PAD), jnp.bfloat16).at[:, :A].set(w2_t.astype(jnp.bfloat16))
    b2p = jnp.full((1, A_PAD), -1e30, dtype=jnp.float32).at[:, :A].set(
        b2.reshape(1, A).astype(jnp.float32))

    # Batch tile: as large as possible (kernel is grid-overhead bound at small
    # sizes).  Single full-batch block when it fits (block dim == full array
    # dim is legal even if not a multiple of 8); otherwise a multiple of 8
    # with a ragged last block handled by Pallas (no explicit jnp.pad of x).
    tb = _round_up(min(block_b, B), 8)
    if tb >= B:
        tb = B
    grid = (pl.cdiv(B, tb),)

    cost = pl.CostEstimate(
        flops=int(2 * B * (S * H + H * A_PAD) + 5 * B * A_PAD),
        transcendentals=int(B * A_PAD),
        bytes_accessed=int(B * S * 2 + S * H * 2 + H * 4
                           + H * A_PAD * 2 + A_PAD * 4 + B * A * 4),
    )

    out = pl.pallas_call(
        policy_net_kernel,
        out_shape=jax.ShapeDtypeStruct((B, A), jnp.float32),
        grid=grid,
        in_specs=[
            pl.BlockSpec((tb, S), lambda i: (i, 0)),        # x: tiled over batch
            pl.BlockSpec((S, H), lambda i: (0, 0)),         # w1: VMEM-resident
            pl.BlockSpec((1, H), lambda i: (0, 0)),         # b1: VMEM-resident
            pl.BlockSpec((H, A_PAD), lambda i: (0, 0)),     # w2 (lane-padded): resident
            pl.BlockSpec((1, A_PAD), lambda i: (0, 0)),     # b2 (lane-padded): resident
        ],
        out_specs=pl.BlockSpec((tb, A), lambda i: (i, 0)),  # narrow (B, A) writeback
        compiler_params=pltpu.CompilerParams(
            dimension_semantics=("parallel",)),             # v7x: shard across 2 TCs
        cost_estimate=cost,
    )(xb, w1b, b1f, w2b, b2p)

    return out


def init_params(key, state_dim, action_dim, hidden_dim):
    """Deterministic init mimicking torch.nn.Linear default U(-1/sqrt(fan_in), 1/sqrt(fan_in))."""
    k1, k2, k3, k4 = jax.random.split(key, 4)
    lim1 = 1.0 / jnp.sqrt(jnp.float32(state_dim))
    lim2 = 1.0 / jnp.sqrt(jnp.float32(hidden_dim))
    # stored already transposed: (in_features, out_features)
    w1_t = jax.random.uniform(k1, (state_dim, hidden_dim), jnp.float32, -lim1, lim1)
    b1 = jax.random.uniform(k2, (1, hidden_dim), jnp.float32, -lim1, lim1)
    w2_t = jax.random.uniform(k3, (hidden_dim, action_dim), jnp.float32, -lim2, lim2)
    b2 = jax.random.uniform(k4, (1, action_dim), jnp.float32, -lim2, lim2)
    return w1_t, b1, w2_t, b2


if __name__ == "__main__":
    # Small GridWorld-style shapes; B=19 deliberately non-multiple-of-8 to
    # exercise the full-batch single-block path (block dim == full array dim)
    # and, with block_b=8, the multi-step grid with a ragged last block.
    B, STATE_DIM, ACTION_DIM, HIDDEN_DIM = 19, 8, 4, 128

    key = jax.random.PRNGKey(0)
    kx, kp = jax.random.split(key)
    x = jax.random.normal(kx, (B, STATE_DIM), dtype=jnp.float32)
    w1_t, b1, w2_t, b2 = init_params(kp, STATE_DIM, ACTION_DIM, HIDDEN_DIM)

    # Default fat-tile (single grid step) and small-tile (3-step grid) runs.
    probs = jax.block_until_ready(policy_net_forward(x, w1_t, b1, w2_t, b2))
    probs_tiled = jax.block_until_ready(
        policy_net_forward(x, w1_t, b1, w2_t, b2, block_b=8))

    # Reference applying the same bf16 rounding to the MXU operands.
    xb = x.astype(jnp.bfloat16)
    w1b = w1_t.astype(jnp.bfloat16)
    w2b = w2_t.astype(jnp.bfloat16)
    h_ref = jnp.maximum(jnp.dot(xb, w1b, preferred_element_type=jnp.float32) + b1, 0.0)
    logits_ref = jnp.dot(h_ref.astype(jnp.bfloat16), w2b,
                         preferred_element_type=jnp.float32) + b2
    probs_ref = jax.nn.softmax(logits_ref, axis=1)

    # Pure-f32 reference (exact PyTorch-module semantics); looser tolerance
    # accounts only for the bf16 MXU operand rounding.
    probs_ref_f32 = jax.nn.softmax(
        jnp.maximum(x @ w1_t + b1, 0.0) @ w2_t + b2, axis=1)

    assert probs.shape == (B, ACTION_DIM)
    assert probs_tiled.shape == (B, ACTION_DIM)
    assert bool(jnp.all(jnp.isfinite(probs)))
    assert jnp.allclose(jnp.sum(probs, axis=1), 1.0, atol=1e-4)          # exact divide
    assert jnp.allclose(probs, probs_tiled, atol=1e-4, rtol=1e-4)        # grid-invariant
    assert jnp.allclose(probs, probs_ref, atol=1e-3, rtol=1e-3)          # bf16-matched ref
    assert jnp.allclose(probs, probs_ref_f32, atol=3e-2, rtol=3e-2)      # f32 module ref

    print("KERNEL_OK")
</pallas_src>

<mosaic_0001>
module attributes {stable_mosaic.version = 11 : i64} {
  func.func @policy_net_kernel(%arg0: i32, %arg1: memref<19x8xbf16, #tpu.memory_space<vmem>>, %arg2: memref<8x128xbf16, #tpu.memory_space<vmem>>, %arg3: memref<1x128xf32, #tpu.memory_space<vmem>>, %arg4: memref<128x128xbf16, #tpu.memory_space<vmem>>, %arg5: memref<1x128xf32, #tpu.memory_space<vmem>>, %arg6: memref<19x4xf32, #tpu.memory_space<vmem>>) attributes {dimension_semantics = [#tpu.dimension_semantics<parallel>], iteration_bounds = array<i64: 1>, scalar_prefetch = 0 : i64, scratch_operands = 0 : i64, tpu.core_type = #tpu.core_type<tc>, window_params = [{transform_indices = @transform_0, window_bounds = array<i64: 19, 8>}, {pipeline_mode = #tpu.pipeline_mode<synchronous>, transform_indices = @transform_1, window_bounds = array<i64: 8, 128>}, {pipeline_mode = #tpu.pipeline_mode<synchronous>, transform_indices = @transform_2, window_bounds = array<i64: 1, 128>}, {pipeline_mode = #tpu.pipeline_mode<synchronous>, transform_indices = @transform_3, window_bounds = array<i64: 128, 128>}, {pipeline_mode = #tpu.pipeline_mode<synchronous>, transform_indices = @transform_4, window_bounds = array<i64: 1, 128>}, {transform_indices = @transform_5, window_bounds = array<i64: 19, 4>}]} {
    %c0 = arith.constant 0 : index
    %c0_0 = arith.constant 0 : index
    %0 = vector.load %arg1[%c0, %c0_0] : memref<19x8xbf16, #tpu.memory_space<vmem>>, vector<19x8xbf16>
    %c0_1 = arith.constant 0 : index
    %c0_2 = arith.constant 0 : index
    %1 = vector.load %arg2[%c0_1, %c0_2] : memref<8x128xbf16, #tpu.memory_space<vmem>>, vector<8x128xbf16>
    %cst = arith.constant dense<0.000000e+00> : vector<19x128xf32>
    %2 = tpu.matmul %0, %1, %cst {dimension_numbers = #tpu.dot_dimension_numbers<[1], [0], [0], [1], [0, 0, 1, 1], [], []>} : vector<19x8xbf16>, vector<8x128xbf16>, vector<19x128xf32> -> vector<19x128xf32>
    %c0_3 = arith.constant 0 : index
    %c0_4 = arith.constant 0 : index
    %3 = vector.load %arg3[%c0_3, %c0_4] : memref<1x128xf32, #tpu.memory_space<vmem>>, vector<1x128xf32>
    %4 = vector.broadcast %3 : vector<1x128xf32> to vector<19x128xf32>
    %5 = arith.addf %2, %4 : vector<19x128xf32>
    %cst_5 = arith.constant 0.000000e+00 : f32
    %6 = vector.broadcast %cst_5 : f32 to vector<19x128xf32>
    %7 = arith.maximumf %5, %6 : vector<19x128xf32>
    %8 = arith.truncf %7 : vector<19x128xf32> to vector<19x128xbf16>
    %c0_6 = arith.constant 0 : index
    %c0_7 = arith.constant 0 : index
    %9 = vector.load %arg4[%c0_6, %c0_7] : memref<128x128xbf16, #tpu.memory_space<vmem>>, vector<128x128xbf16>
    %cst_8 = arith.constant dense<0.000000e+00> : vector<19x128xf32>
    %10 = tpu.matmul %8, %9, %cst_8 {dimension_numbers = #tpu.dot_dimension_numbers<[1], [0], [0], [1], [0, 0, 1, 1], [], []>} : vector<19x128xbf16>, vector<128x128xbf16>, vector<19x128xf32> -> vector<19x128xf32>
    %c0_9 = arith.constant 0 : index
    %c0_10 = arith.constant 0 : index
    %11 = vector.load %arg5[%c0_9, %c0_10] : memref<1x128xf32, #tpu.memory_space<vmem>>, vector<1x128xf32>
    %12 = vector.broadcast %11 : vector<1x128xf32> to vector<19x128xf32>
    %13 = arith.addf %10, %12 : vector<19x128xf32>
    %cst_11 = arith.constant dense<0xFF800000> : vector<19xf32>
    %14 = vector.multi_reduction <maximumf>, %13, %cst_11 [1] : vector<19x128xf32> to vector<19xf32>
    %15 = vector.shape_cast %14 : vector<19xf32> to vector<19x1xf32>
    %16 = vector.broadcast %15 : vector<19x1xf32> to vector<19x128xf32>
    %17 = arith.subf %13, %16 : vector<19x128xf32>
    %18 = math.exp %17 : vector<19x128xf32>
    %cst_12 = arith.constant dense<0.000000e+00> : vector<19xf32>
    %19 = vector.multi_reduction <add>, %18, %cst_12 [1] : vector<19x128xf32> to vector<19xf32>
    %20 = vector.shape_cast %19 : vector<19xf32> to vector<19x1xf32>
    %21 = vector.broadcast %20 : vector<19x1xf32> to vector<19x128xf32>
    %22 = arith.divf %18, %21 : vector<19x128xf32>
    %23 = vector.extract_strided_slice %22 {offsets = [0, 0], sizes = [19, 4], strides = [1, 1]} : vector<19x128xf32> to vector<19x4xf32>
    %c0_13 = arith.constant 0 : index
    %c0_14 = arith.constant 0 : index
    %24 = vector.load %arg6[%c0_13, %c0_14] : memref<19x4xf32, #tpu.memory_space<vmem>>, vector<19x4xf32>
    tpu.vector_store %arg6[%c0_13, %c0_14], %23 {strides = array<i32>} : memref<19x4xf32, #tpu.memory_space<vmem>>, vector<19x4xf32>,
    return
  }
  func.func @transform_0(%arg0: i32) -> (i32, i32) {
    %c0_i32 = arith.constant 0 : i32
    %c0_i32_0 = arith.constant 0 : i32
    return %arg0, %c0_i32 : i32, i32
  }
  func.func @transform_1(%arg0: i32) -> (i32, i32) {
    %c0_i32 = arith.constant 0 : i32
    %c0_i32_0 = arith.constant 0 : i32
    %c0_i32_1 = arith.constant 0 : i32
    return %c0_i32, %c0_i32_0 : i32, i32
  }
  func.func @transform_2(%arg0: i32) -> (i32, i32) {
    %c0_i32 = arith.constant 0 : i32
    %c0_i32_0 = arith.constant 0 : i32
    %c0_i32_1 = arith.constant 0 : i32
    return %c0_i32, %c0_i32_0 : i32, i32
  }
  func.func @transform_3(%arg0: i32) -> (i32, i32) {
    %c0_i32 = arith.constant 0 : i32
    %c0_i32_0 = arith.constant 0 : i32
    %c0_i32_1 = arith.constant 0 : i32
    return %c0_i32, %c0_i32_0 : i32, i32
  }
  func.func @transform_4(%arg0: i32) -> (i32, i32) {
    %c0_i32 = arith.constant 0 : i32
    %c0_i32_0 = arith.constant 0 : i32
    %c0_i32_1 = arith.constant 0 : i32
    return %c0_i32, %c0_i32_0 : i32, i32
  }
  func.func @transform_5(%arg0: i32) -> (i32, i32) {
    %c0_i32 = arith.constant 0 : i32
    %c0_i32_0 = arith.constant 0 : i32
    return %arg0, %c0_i32 : i32, i32
  }
}

</mosaic_0001>

<bundles_post_ra>
// kernel: tpu_custom_call.1
= control target key start
LH: loop header
LB: loop body
LE: loop exit
PB: predicated region body
PF: predicated region fallthrough
CT: control target
= control target key end

     0   :  { %10 = vsyncpa [#allocation3], 0  ;;  %s380_s18 = smov [#allocation2]   ;;  %s451_s0 = inlined_call_operand.vmem [shape: bf16[19,8], index: 0, kind: input, shape index: {}]   ;;  %s452_s1 = inlined_call_operand.vmem [shape: bf16[8,128], index: 1, kind: input, shape index: {}]   ;;  %s453_s2 = inlined_call_operand.vmem [shape: f32[1,128], index: 2, kind: input, shape index: {}]   ;;  %s454_s3 = inlined_call_operand.hbm [shape: bf16[128,128], index: 3, kind: input, shape index: {}]   ;;  %s455_s4 = inlined_call_operand.vmem [shape: f32[1,128], index: 4, kind: input, shape index: {}]   ;;  %s456_s5 = inlined_call_operand.vmem [shape: f32[19,4], index: 5, kind: output, shape index: {}]  }
   0x1   :  { %s22_s19 = sshll.u32 %s380_s18, 4  ;;  %s356_s22 = scalar_lea.hbm %s454_s3, 1024  ;;  %s23_s19 = int_to_ptr.vmem [resolvable:$true] %s22_s19 }
   0x2   :  { %p357_p0 = scmp.ne.s32.totalorder %s454_s3, %s356_s22  ;;  %p360_p1 = scmp.lt.u32.totalorder %s356_s22, %s454_s3 }
   0x4   :  { %p362_p2 = pnand %p360_p1, %p357_p0 }
   0x6   :  { %365 = shalt.err (!%p362_p2)
}
   0x7   :  { %s366_s27 = scalar_lea.vmem %s23_s19, 1024  ;;  %p371_p4 = scmp.lt.s32.totalorder %s23_s19, %s23_s19 }
   0x8   :  { %p367_p3 = scmp.ne.s32.totalorder %s23_s19, %s366_s27  ;;  %p372_p5 = scmp.lt.s32.totalorder %s366_s27, %s366_s27 }
   0xa   :  { %p373_p6 = por %p372_p5, %p371_p4 }
   0xc   :  { %p374_p7 = pnand %p373_p6, %p367_p3 }
   0xe   :  { %377 = shalt.err (!%p374_p7)
}
   0xf   :  { %s381_s28 = smov 64   ;;  %s382_s29 = smov 4  }
  0x10   :  { %28 = dma.hbm_to_vmem [thread:$0]  %s454_s3, 1024, %s23_s19, [#allocation3], %s381_s28, %s381_s28, %s382_s29  }
  0x11   :  { %378 = dma.done.wait [#allocation3], 1024  }
  0x12   :  { %379 = vsyncadd [#allocation3], 4294966272  ;;  %vm61_vm0 = vcmask 1043456   ;;  %vm54_vm1 = vcmask 64512   ;;  %v38_v0 = vld [vmem:[%s452_s1] sm:$0xf] }
  0x13   :  { %330 = vmatprep.subr.msk.bf16.mxu0 %vm61_vm0, %v38_v0  ;;  %v63_v1 = vsel %vm61_vm0, %v38_v0, 0  ;;  %v334_v2 = vld [vmem:[%s451_s0] sm:$0xff]   ;;  %v335_v3 = vld [vmem:[%s451_s0 + $0x8] ss:$0 sps:$4 sm:$0x33]   ;;  %v338_v6 = vld [vmem:[#allocation2 + $0x10] sm:$0xff]  }
  0x14   :  { %305 = vmatpush3.bf16.msra.mxu0 %v63_v1  ;;  %v336_v4 = vld [vmem:[#allocation2] sm:$0xff]   ;;  %306 = vmatprep.mubr.msk.bf16.mxu0 %vm54_vm1, %v334_v2  ;;  %v337_v5 = vld [vmem:[#allocation2 + $0x8] sm:$0xff]   ;;  %v339_v7 = vld [vmem:[#allocation2 + $0x18] sm:$0xff]   ;;  %vm241_vm2 = vcmask 1042432   ;;  %vm267_vm3 = vcmask 31744   ;;  %vm270_vm4 = vcmask 26624  }
  0x15   :  { %310 = vmatprep.subr.bf16.mxu1 %v336_v4  ;;  %v340_v8 = vld [vmem:[#allocation2 + $0x20] sm:$0xff]   ;;  %v341_v9 = vld [vmem:[#allocation2 + $0x28] sm:$0xff]   ;;  %v342_v10 = vld [vmem:[#allocation2 + $0x30] sm:$0xff]  }
  0x16   :  { %311 = vmatpush3.bf16.msra.mxu1 %v336_v4  ;;  %v343_v11 = vld [vmem:[#allocation2 + $0x38] sm:$0xff]   ;;  %v277_v12 = vld [vmem:[%s453_s2] ss:$0 sm:$0xff] }
  0x17   :  { %307 = vmatmul.mubr.msk.bf16.vlgmr.msra.gmra.mrb[0].mxu0 %vm54_vm1, %v335_v3  ;;  %312 = vmatprep.subr.bf16.mxu1 %v337_v5  ;;  %v282_v25 = vld [vmem:[%s455_s4] ss:$0 sm:$0xff] }
  0x1a   :  { %313 = vmatpush3.bf16.msra.mxu1 %v337_v5 }
  0x1b   :  { %314 = vmatprep.subr.bf16.mxu1 %v338_v6 }
  0x1e   :  { %315 = vmatpush3.bf16.msra.mxu1 %v338_v6 }
  0x1f   :  { %316 = vmatprep.subr.bf16.mxu1 %v339_v7 }
  0x22   :  { %317 = vmatpush3.bf16.msra.mxu1 %v339_v7 }
  0x23   :  { %318 = vmatprep.subr.bf16.mxu1 %v340_v8 }
  0x26   :  { %319 = vmatpush3.bf16.msra.mxu1 %v340_v8 }
  0x27   :  { %320 = vmatprep.subr.bf16.mxu1 %v341_v9 }
  0x2a   :  { %321 = vmatpush3.bf16.msra.mxu1 %v341_v9 }
  0x2b   :  { %322 = vmatprep.subr.bf16.mxu1 %v342_v10 }
  0x2e   :  { %323 = vmatpush3.bf16.msra.mxu1 %v342_v10 }
  0x2f   :  { %324 = vmatprep.subr.bf16.mxu1 %v343_v11 }
  0x32   :  { %325 = vmatpush3.bf16.msra.mxu1 %v343_v11 }
  0xea   :  { %v308_v13 = vpop.f32.mrb[0].mxu0 }
  0xeb   :  { %v108_v14 = vadd.f32 %v308_v13, %v277_v12  ;;  %v99_v15 = vpop.f32.mrb[1].mxu0 }
  0xec   :  { %v100_v16 = vadd.f32 %v277_v12, %v99_v15  ;;  %v309_v17 = vpop.f32.mrb[2].mxu0 }
  0xed   :  { %v102_v18 = vpop.f32.mrb[3].mxu0  ;;  %v115_v20 = vmax.f32 %v108_v14, 0.0 }
  0xee   :  { %v103_v19 = vadd.f32 %v277_v12, %v102_v18  ;;  %v113_v21 = vmax.f32 %v100_v16, 0.0 }
  0xef   :  { %v117_v24 = vpack.c.bf16 %v115_v20, %v115_v20 }
  0xf0   :  { %v114_v22 = vmax.f32 %v103_v19, 0.0 }
  0xf2   :  { %v116_v23 = vpack.c.bf16 %v114_v22, %v113_v21 }
  0xf4   :  { %326 = vmatprep.mubr.bf16.mxu1 %v116_v23 }
  0xf5   :  { %327 = vmatmul.mubr.bf16.vlgmr.msra.gmra.mrb[0].mxu1 %v117_v24 }
 0x1c8   :  { %v328_v26 = vpop.f32.mrb[0].mxu1 }
 0x1c9   :  { %v232_v27 = vadd.f32 %v328_v26, %v282_v25  ;;  %v223_v28 = vpop.f32.mrb[1].mxu1 }
 0x1ca   :  { %v329_v29 = vpop.f32.mrb[2].mxu1  ;;  %v224_v33 = vadd.f32 %v282_v25, %v223_v28 }
 0x1cb   :  { %v226_v30 = vpop.f32.mrb[3].mxu1  ;;  %v242_v31 = vsel %vm241_vm2, %v232_v27, -inf }
 0x1cc   :  { %v227_v32 = vadd.f32 %v282_v25, %v226_v30  ;;  %243 = vmax.xlane.f32.xlu0 %v242_v31 }
 0x1ce   :  { %239 = vmax.xlane.f32.xlu1 %v227_v32 }
 0x1d0   :  { %237 = vmax.xlane.f32.xlu0 %v224_v33 }
 0x259   :  { %v244_v34 = vpop.xlane.xlu0 %243 }
 0x25a   :  { %v247_v35 = vsub.f32 %v232_v27, %v244_v34 }
 0x25b   :  { %v240_v36 = vpop.xlane.xlu1 %239 }
 0x25c   :  { %v246_v37 = vsub.f32 %v227_v32, %v240_v36  ;;  %v252_v41 = vmul.f32 1.442695, %v247_v35 }
 0x25d   :  { %v238_v38 = vpop.xlane.xlu0 %237 }
 0x25e   :  { %v250_v39 = vmul.f32 1.442695, %v246_v37  ;;  %v245_v40 = vsub.f32 %v224_v33, %v238_v38 }
 0x260   :  { %344 = vpow2.f32 %v250_v39  ;;  %v248_v42 = vmul.f32 1.442695, %v245_v40 }
 0x262   :  { %346 = vpow2.f32 %v248_v42 }
 0x263   :  { %348 = vpow2.f32 %v252_v41 }
 0x26a   :  { %v345_v43 = vpop.eup %344 }
 0x26b   :  { %256 = vadd.xlane.f32.xlu0 %v345_v43 }
 0x26c   :  { %v347_v44 = vpop.eup %346 }
 0x26d   :  { %v349_v45 = vpop.eup %348  ;;  %254 = vadd.xlane.f32.xlu1 %v347_v44 }
 0x26e   :  { %v258_v46 = vsel %vm241_vm2, %v349_v45, 0.0 }
 0x271   :  { %259 = vadd.xlane.f32.xlu1 %v258_v46 }
 0x2f8   :  { %v257_v47 = vpop.xlane.xlu0 %256 }
 0x2f9   :  { %350 = vrcp.f32 %v257_v47 }
 0x2fa   :  { %v255_v48 = vpop.xlane.xlu1 %254 }
 0x2fb   :  { %352 = vrcp.f32 %v255_v48 }
 0x2fe   :  { %v260_v49 = vpop.xlane.xlu1 %259 }
 0x2ff   :  { %354 = vrcp.f32 %v260_v49 }
 0x303   :  { %v351_v50 = vpop.eup %350 }
 0x304   :  { %v264_v51 = vmul.f32 %v351_v50, %v345_v43 }
 0x305   :  { %v353_v52 = vpop.eup %352 }
 0x306   :  { %269 = vst.msk [vmem:[%s456_s5 + $0x8] sm:$0xff] %vm267_vm3, %v264_v51  ;;  %v262_v53 = vmul.f32 %v353_v52, %v347_v44 }
 0x308   :  { %268 = vst.msk [vmem:[%s456_s5] sm:$0xff] %vm267_vm3, %v262_v53 }
 0x309   :  { %v355_v54 = vpop.eup %354 }
 0x30a   :  { %v266_v55 = vmul.f32 %v355_v54, %v349_v45 }
 0x30c   :  { %271 = vst.msk [vmem:[%s456_s5 + $0x10] sm:$0x7] %vm270_vm4, %v266_v55 }
 0x30d   :  { %276 = vsyncpa [#allocation3], 1 }

</bundles_post_ra>
